<compile_context>
chip_gen: v7x
topology: tpu7x:2x2x1
jax: 0.10.0
libtpu: 0.0.40
codegen_flags: <defaults>
</compile_context>

<pallas_src>
import jax
import jax.numpy as jnp
from jax.experimental import pallas as pl
from jax.experimental.pallas import tpu as pltpu

_NEG_BIG = -1e30  # effectively -inf for the f32 softmax, without inf arithmetic


def _round_up(n, m):
    return ((n + m - 1) // m) * m


def sentiment_mlp_kernel(x_ref, w1_ref, b1_ref, w2_ref, b2_ref, o_ref):
    x = x_ref[...]                                                    # [TB, F]

    # Linear 1 (MXU, 128-wide padded hidden) + bias, ReLU on the VPU.
    h = jnp.dot(x, w1_ref[...], preferred_element_type=jnp.float32)  # [TB, HP]
    h = jnp.maximum(h + b1_ref[...], 0.0)

    # Linear 2 (MXU) + bias -> padded logits [TB, CP].
    # Padded lanes: w2 columns are zero and b2 lanes are -1e30, so the padded
    # logits are exactly -1e30 (no extra masking needed in-kernel).
    logits = jnp.dot(h, w2_ref[...], preferred_element_type=jnp.float32)
    logits = logits + b2_ref[...]

    # Numerically stable log-softmax over the class (lane) axis.
    m = jnp.max(logits, axis=1, keepdims=True)                        # [TB, 1]
    shifted = logits - m                                              # padded lanes ~ -1e30
    lse = jnp.log(jnp.sum(jnp.exp(shifted), axis=1, keepdims=True))   # exp underflows to 0 on pad
    o_ref[...] = (shifted - lse).astype(o_ref.dtype)


def sentiment_model_forward(x, w1, b1, w2, b2):
    """x: [B, F]; w1: [F, H]; b1: [H] or [1, H]; w2: [H, C]; b2: [C] or [1, C]."""
    B, F = x.shape
    H = w1.shape[1]
    C = w2.shape[1]

    HP = _round_up(H, 128)            # padded hidden width  (MXU / lane friendly)
    CP = _round_up(C, 128)            # padded class width   (lane-dense output)
    TB = min(512, _round_up(B, 8))    # batch tile (multiple of 8 sublanes)
    BP = _round_up(B, TB)             # padded batch

    f32 = jnp.float32
    x_p = jnp.pad(x.astype(f32), ((0, BP - B), (0, 0)))
    w1_p = jnp.pad(w1.astype(f32), ((0, 0), (0, HP - H)))
    b1_p = jnp.pad(b1.reshape(1, H).astype(f32), ((0, 0), (0, HP - H)))
    w2_p = jnp.pad(w2.astype(f32), ((0, HP - H), (0, CP - C)))
    # Bake the class-padding mask into the bias: padded lanes get -1e30.
    b2_p = jnp.pad(b2.reshape(1, C).astype(f32), ((0, 0), (0, CP - C)),
                   constant_values=_NEG_BIG)

    out_padded = pl.pallas_call(
        sentiment_mlp_kernel,
        out_shape=jax.ShapeDtypeStruct((BP, CP), jnp.float32),
        grid=(BP // TB,),
        in_specs=[
            pl.BlockSpec((TB, F), lambda i: (i, 0)),    # batch-tiled activations
            pl.BlockSpec((F, HP), lambda i: (0, 0)),    # weights stay VMEM-resident
            pl.BlockSpec((1, HP), lambda i: (0, 0)),
            pl.BlockSpec((HP, CP), lambda i: (0, 0)),
            pl.BlockSpec((1, CP), lambda i: (0, 0)),
        ],
        out_specs=pl.BlockSpec((TB, CP), lambda i: (i, 0)),
        compiler_params=pltpu.CompilerParams(
            dimension_semantics=("parallel",),  # batch axis -> megacore sharding on v7x
        ),
    )(x_p, w1_p, b1_p, w2_p, b2_p)

    # Strip batch / class padding outside the kernel.
    return out_padded[:B, :C]


def reference_forward(x, w1, b1, w2, b2):
    h = jnp.maximum(x @ w1 + b1.reshape(1, -1), 0.0)
    logits = h @ w2 + b2.reshape(1, -1)
    return jax.nn.log_softmax(logits, axis=1)


if __name__ == "__main__":
    NUM_FEATURES = 32
    HIDDEN = 10
    NUM_CLASSES = 4
    BATCH = 8

    key = jax.random.PRNGKey(0)
    kx, k1, k2, k3, k4 = jax.random.split(key, 5)

    # Deterministic synthetic parameters (PyTorch-like uniform init ranges).
    x = jax.random.normal(kx, (BATCH, NUM_FEATURES), dtype=jnp.float32)
    bound1 = 1.0 / (NUM_FEATURES ** 0.5)
    w1 = jax.random.uniform(k1, (NUM_FEATURES, HIDDEN), jnp.float32, -bound1, bound1)
    b1 = jax.random.uniform(k2, (1, HIDDEN), jnp.float32, -bound1, bound1)
    bound2 = 1.0 / (HIDDEN ** 0.5)
    w2 = jax.random.uniform(k3, (HIDDEN, NUM_CLASSES), jnp.float32, -bound2, bound2)
    b2 = jax.random.uniform(k4, (1, NUM_CLASSES), jnp.float32, -bound2, bound2)

    out = sentiment_model_forward(x, w1, b1, w2, b2)
    out = jax.block_until_ready(out)

    ref = reference_forward(x, w1, b1, w2, b2)
    assert out.shape == (BATCH, NUM_CLASSES)
    assert jnp.allclose(out, ref, atol=1e-5, rtol=1e-5)

    print("KERNEL_OK")
</pallas_src>

<mosaic_0001>
module attributes {stable_mosaic.version = 11 : i64} {
  func.func @sentiment_mlp_kernel(%arg0: i32, %arg1: memref<8x32xf32, #tpu.memory_space<vmem>>, %arg2: memref<32x128xf32, #tpu.memory_space<vmem>>, %arg3: memref<1x128xf32, #tpu.memory_space<vmem>>, %arg4: memref<128x128xf32, #tpu.memory_space<vmem>>, %arg5: memref<1x128xf32, #tpu.memory_space<vmem>>, %arg6: memref<8x128xf32, #tpu.memory_space<vmem>>) attributes {dimension_semantics = [#tpu.dimension_semantics<parallel>], iteration_bounds = array<i64: 1>, scalar_prefetch = 0 : i64, scratch_operands = 0 : i64, tpu.core_type = #tpu.core_type<tc>, window_params = [{transform_indices = @transform_0, window_bounds = array<i64: 8, 32>}, {pipeline_mode = #tpu.pipeline_mode<synchronous>, transform_indices = @transform_1, window_bounds = array<i64: 32, 128>}, {pipeline_mode = #tpu.pipeline_mode<synchronous>, transform_indices = @transform_2, window_bounds = array<i64: 1, 128>}, {pipeline_mode = #tpu.pipeline_mode<synchronous>, transform_indices = @transform_3, window_bounds = array<i64: 128, 128>}, {pipeline_mode = #tpu.pipeline_mode<synchronous>, transform_indices = @transform_4, window_bounds = array<i64: 1, 128>}, {transform_indices = @transform_5, window_bounds = array<i64: 8, 128>}]} {
    %c0 = arith.constant 0 : index
    %c0_0 = arith.constant 0 : index
    %0 = vector.load %arg1[%c0, %c0_0] : memref<8x32xf32, #tpu.memory_space<vmem>>, vector<8x32xf32>
    %c0_1 = arith.constant 0 : index
    %c0_2 = arith.constant 0 : index
    %1 = vector.load %arg2[%c0_1, %c0_2] : memref<32x128xf32, #tpu.memory_space<vmem>>, vector<32x128xf32>
    %cst = arith.constant dense<0.000000e+00> : vector<8x128xf32>
    %2 = tpu.matmul %0, %1, %cst {dimension_numbers = #tpu.dot_dimension_numbers<[1], [0], [0], [1], [0, 0, 1, 1], [], []>} : vector<8x32xf32>, vector<32x128xf32>, vector<8x128xf32> -> vector<8x128xf32>
    %c0_3 = arith.constant 0 : index
    %c0_4 = arith.constant 0 : index
    %3 = vector.load %arg3[%c0_3, %c0_4] : memref<1x128xf32, #tpu.memory_space<vmem>>, vector<1x128xf32>
    %4 = vector.broadcast %3 : vector<1x128xf32> to vector<8x128xf32>
    %5 = arith.addf %2, %4 : vector<8x128xf32>
    %cst_5 = arith.constant 0.000000e+00 : f32
    %6 = vector.broadcast %cst_5 : f32 to vector<8x128xf32>
    %7 = arith.maximumf %5, %6 : vector<8x128xf32>
    %c0_6 = arith.constant 0 : index
    %c0_7 = arith.constant 0 : index
    %8 = vector.load %arg4[%c0_6, %c0_7] : memref<128x128xf32, #tpu.memory_space<vmem>>, vector<128x128xf32>
    %cst_8 = arith.constant dense<0.000000e+00> : vector<8x128xf32>
    %9 = tpu.matmul %7, %8, %cst_8 {dimension_numbers = #tpu.dot_dimension_numbers<[1], [0], [0], [1], [0, 0, 1, 1], [], []>} : vector<8x128xf32>, vector<128x128xf32>, vector<8x128xf32> -> vector<8x128xf32>
    %c0_9 = arith.constant 0 : index
    %c0_10 = arith.constant 0 : index
    %10 = vector.load %arg5[%c0_9, %c0_10] : memref<1x128xf32, #tpu.memory_space<vmem>>, vector<1x128xf32>
    %11 = vector.broadcast %10 : vector<1x128xf32> to vector<8x128xf32>
    %12 = arith.addf %9, %11 : vector<8x128xf32>
    %cst_11 = arith.constant dense<0xFF800000> : vector<8xf32>
    %13 = vector.multi_reduction <maximumf>, %12, %cst_11 [1] : vector<8x128xf32> to vector<8xf32>
    %14 = vector.shape_cast %13 : vector<8xf32> to vector<8x1xf32>
    %15 = vector.broadcast %14 : vector<8x1xf32> to vector<8x128xf32>
    %16 = arith.subf %12, %15 : vector<8x128xf32>
    %17 = math.exp %16 : vector<8x128xf32>
    %cst_12 = arith.constant dense<0.000000e+00> : vector<8xf32>
    %18 = vector.multi_reduction <add>, %17, %cst_12 [1] : vector<8x128xf32> to vector<8xf32>
    %19 = vector.shape_cast %18 : vector<8xf32> to vector<8x1xf32>
    %20 = math.log %19 : vector<8x1xf32>
    %21 = vector.broadcast %20 : vector<8x1xf32> to vector<8x128xf32>
    %22 = arith.subf %16, %21 : vector<8x128xf32>
    %c0_13 = arith.constant 0 : index
    %c0_14 = arith.constant 0 : index
    %23 = vector.load %arg6[%c0_13, %c0_14] : memref<8x128xf32, #tpu.memory_space<vmem>>, vector<8x128xf32>
    tpu.vector_store %arg6[%c0_13, %c0_14], %22 {strides = array<i32>} : memref<8x128xf32, #tpu.memory_space<vmem>>, vector<8x128xf32>,
    return
  }
  func.func @transform_0(%arg0: i32) -> (i32, i32) {
    %c0_i32 = arith.constant 0 : i32
    %c0_i32_0 = arith.constant 0 : i32
    return %arg0, %c0_i32 : i32, i32
  }
  func.func @transform_1(%arg0: i32) -> (i32, i32) {
    %c0_i32 = arith.constant 0 : i32
    %c0_i32_0 = arith.constant 0 : i32
    %c0_i32_1 = arith.constant 0 : i32
    return %c0_i32, %c0_i32_0 : i32, i32
  }
  func.func @transform_2(%arg0: i32) -> (i32, i32) {
    %c0_i32 = arith.constant 0 : i32
    %c0_i32_0 = arith.constant 0 : i32
    %c0_i32_1 = arith.constant 0 : i32
    return %c0_i32, %c0_i32_0 : i32, i32
  }
  func.func @transform_3(%arg0: i32) -> (i32, i32) {
    %c0_i32 = arith.constant 0 : i32
    %c0_i32_0 = arith.constant 0 : i32
    %c0_i32_1 = arith.constant 0 : i32
    return %c0_i32, %c0_i32_0 : i32, i32
  }
  func.func @transform_4(%arg0: i32) -> (i32, i32) {
    %c0_i32 = arith.constant 0 : i32
    %c0_i32_0 = arith.constant 0 : i32
    %c0_i32_1 = arith.constant 0 : i32
    return %c0_i32, %c0_i32_0 : i32, i32
  }
  func.func @transform_5(%arg0: i32) -> (i32, i32) {
    %c0_i32 = arith.constant 0 : i32
    %c0_i32_0 = arith.constant 0 : i32
    return %arg0, %c0_i32 : i32, i32
  }
}

</mosaic_0001>

<bundles_post_ra>
// kernel: tpu_custom_call.1
= control target key start
LH: loop header
LB: loop body
LE: loop exit
PB: predicated region body
PF: predicated region fallthrough
CT: control target
= control target key end

     0   :  { %10 = vsyncpa [#allocation3], 0  ;;  %s574_s0 = inlined_call_operand.hbm [shape: f32[8,32], index: 0, kind: input, shape index: {}]   ;;  %s575_s1 = inlined_call_operand.hbm [shape: f32[32,128], index: 1, kind: input, shape index: {}]   ;;  %s576_s2 = inlined_call_operand.vmem [shape: f32[1,128], index: 2, kind: input, shape index: {}]   ;;  %s577_s3 = inlined_call_operand.hbm [shape: f32[128,128], index: 3, kind: input, shape index: {}]   ;;  %s578_s4 = inlined_call_operand.vmem [shape: f32[1,128], index: 4, kind: input, shape index: {}]   ;;  %s579_s5 = inlined_call_operand.hbm [shape: f32[8,128], index: 5, kind: output, shape index: {}]  }
   0x1   :  { %11 = vsyncpa [#allocation6], 0 }
   0x2   :  { %12 = vsyncpa [#allocation4], 0  ;;  %s475_s18 = smov [#allocation5]   ;;  %s381_s22 = scalar_lea.hbm %s575_s1, 512 }
   0x3   :  { %s28_s19 = sshll.u32 %s475_s18, 4  ;;  %p382_p0 = scmp.ne.s32.totalorder %s575_s1, %s381_s22  ;;  %s29_s19 = int_to_ptr.vmem [resolvable:$true] %s28_s19 }
   0x4   :  { %p385_p1 = scmp.lt.u32.totalorder %s381_s22, %s575_s1 }
   0x6   :  { %p387_p2 = pnand %p385_p1, %p382_p0 }
   0x8   :  { %390 = shalt.err (!%p387_p2)
}
   0x9   :  { %s391_s27 = scalar_lea.vmem %s29_s19, 512  ;;  %p396_p4 = scmp.lt.s32.totalorder %s29_s19, %s29_s19 }
   0xa   :  { %p392_p3 = scmp.ne.s32.totalorder %s29_s19, %s391_s27  ;;  %p397_p5 = scmp.lt.s32.totalorder %s391_s27, %s391_s27 }
   0xc   :  { %p398_p6 = por %p397_p5, %p396_p4 }
   0xe   :  { %p399_p7 = pnand %p398_p6, %p392_p3 }
  0x10   :  { %402 = shalt.err (!%p399_p7)
}
  0x11   :  { %s476_s28 = smov 128   ;;  %s477_s29 = smov 8  }
  0x12   :  { %34 = dma.hbm_to_vmem [thread:$0]  %s575_s1, 512, %s29_s19, [#allocation6], %s476_s28, %s476_s28, %s477_s29  }
  0x13   :  { %s478_s7 = smov [#allocation2]   ;;  %s479_s9 = smov [#allocation7]  }
  0x14   :  { %s19_s8 = sshll.u32 %s478_s7, 4  ;;  %s42_s10 = sshll.u32 %s479_s9, 4  ;;  %s20_s8 = int_to_ptr.vmem [resolvable:$true] %s19_s8  ;;  %s43_s10 = int_to_ptr.vmem [resolvable:$true] %s42_s10 }
  0x15   :  { %s403_s13 = scalar_lea.hbm %s574_s0, 128 }
  0x16   :  { %p404_p8 = scmp.ne.s32.totalorder %s574_s0, %s403_s13  ;;  %p407_p9 = scmp.lt.u32.totalorder %s403_s13, %s574_s0 }
  0x18   :  { %p409_p10 = pnand %p407_p9, %p404_p8 }
  0x1a   :  { %412 = shalt.err (!%p409_p10)
}
  0x1b   :  { %s413_s1 = scalar_lea.vmem %s20_s8, 128  ;;  %p418_p12 = scmp.lt.s32.totalorder %s20_s8, %s20_s8 }
  0x1c   :  { %p414_p11 = scmp.ne.s32.totalorder %s20_s8, %s413_s1  ;;  %p419_p13 = scmp.lt.s32.totalorder %s413_s1, %s413_s1 }
  0x1e   :  { %p420_p0 = por %p419_p13, %p418_p12 }
  0x20   :  { %p421_p1 = pnand %p420_p0, %p414_p11 }
  0x22   :  { %424 = shalt.err (!%p421_p1)
}
  0x23   :  { %22 = dma.hbm_to_vmem [thread:$0]  %s574_s0, 128, %s20_s8, [#allocation3]  }
  0x24   :  { %s425_s22 = scalar_lea.hbm %s577_s3, 2048 }
  0x25   :  { %p426_p2 = scmp.ne.s32.totalorder %s577_s3, %s425_s22  ;;  %p429_p3 = scmp.lt.u32.totalorder %s425_s22, %s577_s3 }
  0x27   :  { %p431_p4 = pnand %p429_p3, %p426_p2 }
  0x29   :  { %434 = shalt.err (!%p431_p4)
}
  0x2a   :  { %s435_s27 = scalar_lea.vmem %s43_s10, 2048  ;;  %p440_p6 = scmp.lt.s32.totalorder %s43_s10, %s43_s10 }
  0x2b   :  { %p436_p5 = scmp.ne.s32.totalorder %s43_s10, %s435_s27  ;;  %p441_p7 = scmp.lt.s32.totalorder %s435_s27, %s435_s27 }
  0x2d   :  { %p442_p8 = por %p441_p7, %p440_p6 }
  0x2f   :  { %p443_p9 = pnand %p442_p8, %p436_p5 }
  0x31   :  { %446 = shalt.err (!%p443_p9)
}
  0x32   :  { %48 = dma.hbm_to_vmem [thread:$0]  %s577_s3, 2048, %s43_s10, [#allocation6], %s476_s28, %s476_s28, %s477_s29  }
  0x33   :  { %469 = dma.done.wait [#allocation3], 128  }
  0x34   :  { %470 = vsyncadd [#allocation3], 4294967168 }
  0x35   :  { %471 = dma.done.wait [#allocation6], 2560  }
  0x36   :  { %472 = vsyncadd [#allocation6], 4294964736  ;;  %v480_v0 = vmov 0.0|0.0   ;;  %vm481_vm0 = vmmov 0   ;;  %v482_v1 = vmov 0.0   ;;  %v61_v2 = vld [vmem:[#allocation5] sm:$0xff] }
  0x37   :  { %338 = vmatprep.subr.bf16.mxu0 %v480_v0  ;;  %300 = vmatprep.mubr.msk.f32.mxu0 %vm481_vm0, %v482_v1  ;;  %v62_v3 = vld [vmem:[#allocation5 + $0x8] sm:$0xff]  ;;  %v63_v4 = vld [vmem:[#allocation5 + $0x10] sm:$0xff]  ;;  %v64_v6 = vld [vmem:[#allocation5 + $0x18] sm:$0xff]  ;;  %vm72_vm1 = vcmask 261120  }
  0x38   :  { %344 = vmatprep.subr.bf16.mxu1 %v480_v0  ;;  %335 = vmatprep.mubr.msk.f32.mxu1 %vm481_vm0, %v482_v1  ;;  %v339_v5 = vpack.c.bf16 %v62_v3, %v61_v2  ;;  %v147_v7 = vld [vmem:[#allocation7] sm:$0xff]  ;;  %v148_v8 = vld [vmem:[#allocation7 + $0x8] sm:$0xff]  ;;  %v149_v9 = vld [vmem:[#allocation7 + $0x10] sm:$0xff]  ;;  %v342_v11 = vpack.c.bf16 %v64_v6, %v63_v4 }
  0x39   :  { %v150_v10 = vld [vmem:[#allocation7 + $0x18] sm:$0xff]  ;;  %v345_v12 = vpack.c.bf16 %v148_v8, %v147_v7  ;;  %v151_v14 = vld [vmem:[#allocation7 + $0x20] sm:$0xff]  ;;  %v152_v15 = vld [vmem:[#allocation7 + $0x28] sm:$0xff] }
  0x3a   :  { %340 = vmatpush3.bf16.msra.mxu0 %v339_v5  ;;  %v348_v13 = vpack.c.bf16 %v150_v10, %v149_v9  ;;  %v60_v16 = vld [vmem:[#allocation2] sm:$0xff]  ;;  %v351_v17 = vpack.c.bf16 %v152_v15, %v151_v14  ;;  %v153_v18 = vld [vmem:[#allocation7 + $0x30] sm:$0xff]  ;;  %v155_v21 = vld [vmem:[#allocation7 + $0x40] sm:$0xff] }
  0x3b   :  { %341 = vmatprep.subr.bf16.mxu0 %v480_v0  ;;  %346 = vmatpush3.bf16.msra.mxu1 %v345_v12  ;;  %v154_v19 = vld [vmem:[#allocation7 + $0x38] sm:$0xff]  ;;  %v156_v22 = vld [vmem:[#allocation7 + $0x48] sm:$0xff]  ;;  %v157_v24 = vld [vmem:[#allocation7 + $0x50] sm:$0xff] }
  0x3c   :  { %347 = vmatprep.subr.bf16.mxu1 %v480_v0  ;;  %v354_v20 = vpack.c.bf16 %v154_v19, %v153_v18  ;;  %v357_v23 = vpack.c.bf16 %v156_v22, %v155_v21  ;;  %v158_v25 = vld [vmem:[#allocation7 + $0x58] sm:$0xff]  ;;  %v159_v27 = vld [vmem:[#allocation7 + $0x60] sm:$0xff]  ;;  %v160_v28 = vld [vmem:[#allocation7 + $0x68] sm:$0xff] }
  0x3d   :  { %v360_v26 = vpack.c.bf16 %v158_v25, %v157_v24  ;;  %v363_v29 = vpack.c.bf16 %v160_v28, %v159_v27  ;;  %v161_v30 = vld [vmem:[#allocation7 + $0x70] sm:$0xff]  ;;  %v162_v31 = vld [vmem:[#allocation7 + $0x78] sm:$0xff] }
  0x3e   :  { %343 = vmatpush3.bf16.msra.mxu0 %v342_v11  ;;  %v366_v32 = vpack.c.bf16 %v162_v31, %v161_v30  ;;  %v267_v33 = vld [vmem:[%s576_s2] ss:$0 sm:$0xff]  ;;  %s483_s2 = smov [#allocation8]  }
  0x3f   :  { %349 = vmatpush3.bf16.msra.mxu1 %v348_v13  ;;  %v269_v38 = vld [vmem:[%s578_s4] ss:$0 sm:$0xff]  ;;  %s257_s7 = sshll.u32 %s483_s2, 4  ;;  %s258_s7 = int_to_ptr.vmem [resolvable:$true] %s257_s7 }
  0x40   :  { %350 = vmatprep.subr.bf16.mxu1 %v480_v0  ;;  %s447_s4 = scalar_lea.vmem %s258_s7, 128  ;;  %p452_p11 = scmp.lt.s32.totalorder %s258_s7, %s258_s7 }
  0x41   :  { %301 = vmatmul.mubr.msk.f32.vlgmr.msra.gmra.mrb[0].mxu0 %vm72_vm1, %v60_v16  ;;  %p448_p10 = scmp.ne.s32.totalorder %s258_s7, %s447_s4  ;;  %p453_p12 = scmp.lt.s32.totalorder %s447_s4, %s447_s4 }
  0x43   :  { %352 = vmatpush3.bf16.msra.mxu1 %v351_v17  ;;  %p454_p13 = por %p453_p12, %p452_p11 }
  0x44   :  { %353 = vmatprep.subr.bf16.mxu1 %v480_v0 }
  0x45   :  { %p455_p0 = pnand %p454_p13, %p448_p10 }
  0x47   :  { %355 = vmatpush3.bf16.msra.mxu1 %v354_v20 }
  0x48   :  { %356 = vmatprep.subr.bf16.mxu1 %v480_v0 }
  0x4b   :  { %358 = vmatpush3.bf16.msra.mxu1 %v357_v23 }
  0x4c   :  { %359 = vmatprep.subr.bf16.mxu1 %v480_v0 }
  0x4f   :  { %361 = vmatpush3.bf16.msra.mxu1 %v360_v26 }
  0x50   :  { %362 = vmatprep.subr.bf16.mxu1 %v480_v0 }
  0x53   :  { %364 = vmatpush3.bf16.msra.mxu1 %v363_v29 }
  0x54   :  { %365 = vmatprep.subr.bf16.mxu1 %v480_v0 }
  0x57   :  { %367 = vmatpush3.bf16.msra.mxu1 %v366_v32 }
 0x114   :  { %v142_v34 = vpop.f32.mrb[0].mxu0 }
 0x115   :  { %v143_v35 = vadd.f32 %v267_v33, %v142_v34  ;;  %v302_v36 = vpop.f32.mrb[1].mxu0 }
 0x117   :  { %v146_v37 = vmax.f32 %v143_v35, 0.0 }
 0x119   :  { %336 = vmatmul.mubr.f32.vlgmr.msra.gmra.mrb[0].mxu1 %v146_v37 }
 0x1ec   :  { %v236_v39 = vpop.f32.mrb[0].mxu1 }
 0x1ed   :  { %v237_v40 = vadd.f32 %v269_v38, %v236_v39  ;;  %v337_v41 = vpop.f32.mrb[1].mxu1 }
 0x1ef   :  { %240 = vmax.xlane.f32.xlu0 %v237_v40 }
 0x27c   :  { %v241_v42 = vpop.xlane.xlu0 %240 }
 0x27d   :  { %v242_v43 = vsub.f32 %v237_v40, %v241_v42 }
 0x27f   :  { %v243_v44 = vmul.f32 1.442695, %v242_v43 }
 0x281   :  { %377 = vpow2.f32 %v243_v44 }
 0x28b   :  { %v378_v45 = vpop.eup %377 }
 0x28c   :  { %245 = vadd.xlane.f32.xlu0 %v378_v45 }
 0x319   :  { %v246_v46 = vpop.xlane.xlu0 %245 }
 0x31a   :  { %379 = vlog2.f32 %v246_v46 }
 0x324   :  { %v380_v47 = vpop.eup %379 }
 0x325   :  { %v248_v48 = vmul.f32 0.6931472, %v380_v47 }
 0x327   :  { %v249_v49 = vsub.f32 %v242_v43, %v248_v48 }
 0x329   :  { %250 = vst [vmem:[#allocation8] sm:$0xff] %v249_v49 }
 0x32a   :  { %458 = shalt.err (!%p455_p0)
}
 0x32b   :  { %s459_s10 = scalar_lea.hbm %s579_s5, 128 }
 0x32c   :  { %p460_p1 = scmp.ne.s32.totalorder %s579_s5, %s459_s10  ;;  %p463_p2 = scmp.lt.u32.totalorder %s459_s10, %s579_s5 }
 0x32e   :  { %p465_p3 = pnand %p463_p2, %p460_p1 }
 0x330   :  { %468 = shalt.err (!%p465_p3)
}
 0x331   :  { %260 = dma.vmem_to_hbm [thread:$0]  %s258_s7, 128, %s579_s5, [#allocation4]  }
 0x332   :  { %473 = dma.done.wait [#allocation4], 128  }
 0x333   :  { %474 = vsyncadd [#allocation4], 4294967168 }
 0x334   :  { %264 = vsyncpa [#allocation3], 1 }
 0x335   :  { %265 = vsyncpa [#allocation6], 1 }
 0x336   :  { %266 = vsyncpa [#allocation4], 1 }

</bundles_post_ra>
